<compile_context>
chip_gen: v6e
topology: v6e:2x2x1
jax: 0.10.0
libtpu: 0.0.40
codegen_flags: <defaults>
</compile_context>

<pallas_src>
import math

import jax
import jax.numpy as jnp
from jax.experimental import pallas as pl
from jax.experimental.pallas import tpu as pltpu


def _cdiv(a, b):
    return (a + b - 1) // b


def _round_up(x, m):
    return _cdiv(x, m) * m


def _pad_to(x, axis, new_size):
    if x.shape[axis] == new_size:
        return x
    widths = [(0, 0)] * x.ndim
    widths[axis] = (0, new_size - x.shape[axis])
    return jnp.pad(x, widths)


def _vmem_capacity_bytes():
    try:
        info = pltpu.get_tpu_info()
        for attr in ("vmem_capacity_bytes", "vmem_bytes", "vmem_size_bytes"):
            v = getattr(info, attr, None)
            if v:
                return int(v)
    except Exception:
        pass
    return 64 << 20  # conservative default: v7x per-TensorCore VMEM


# ---------------------------------------------------------------------------
# Kernels
# ---------------------------------------------------------------------------
def _mlp_kernel_resident(h_ref, w1_ref, b1_ref, w2_ref, b2_ref, o_ref):
    """Whole hidden dim per step; weights live single-buffered in VMEM."""
    hidden = jnp.dot(h_ref[...], w1_ref[...], preferred_element_type=jnp.float32)
    hidden = jnp.maximum(hidden + b1_ref[...], 0.0)
    out = jnp.dot(hidden.astype(w2_ref.dtype), w2_ref[...],
                  preferred_element_type=jnp.float32)
    o_ref[...] = (out + b2_ref[...]).astype(o_ref.dtype)


def _mlp_kernel_hidden_tiled(h_ref, w1_ref, b1_ref, w2_ref, b2_ref, o_ref, acc_ref):
    """Hidden dim tiled over grid axis 1 with an f32 accumulator in scratch."""
    e = pl.program_id(1)

    @pl.when(e == 0)
    def _():
        acc_ref[...] = jnp.zeros_like(acc_ref)

    hidden = jnp.dot(h_ref[...], w1_ref[...], preferred_element_type=jnp.float32)
    hidden = jnp.maximum(hidden + b1_ref[...], 0.0)
    acc_ref[...] += jnp.dot(hidden.astype(w2_ref.dtype), w2_ref[...],
                            preferred_element_type=jnp.float32)

    @pl.when(e == pl.num_programs(1) - 1)
    def _():
        o_ref[...] = (acc_ref[...] + b2_ref[...]).astype(o_ref.dtype)


# ---------------------------------------------------------------------------
# Wrapper
# ---------------------------------------------------------------------------
def mlp_plain_forward(h, w1, b1, w2, b2, *, tm=None):
    """h: [..., h_size] -> y: [..., y_size] via a fused Pallas TPU kernel."""
    orig_shape = h.shape
    h_size = orig_shape[-1]
    m = math.prod(orig_shape[:-1])  # static Python int, no device round-trip
    emb = w1.shape[1]
    y_size = w2.shape[1]
    act_dtype = h.dtype

    b1 = b1.reshape(1, emb)
    b2 = b2.reshape(1, y_size)

    abytes = jnp.dtype(act_dtype).itemsize
    wbytes = jnp.dtype(w1.dtype).itemsize
    sub = 16 if act_dtype == jnp.bfloat16 else 8

    # Lane/sublane-padded sizes used only for the VMEM estimate; h / y stay
    # unpadded in HBM (full-extent blocks).
    h_lanes = _round_up(h_size, 128)
    y_lanes = _round_up(y_size, 128)
    h_subl = _round_up(h_size, 8)

    # ---- Generation-aware VMEM budget (v7x: 64 MiB/TC, v5e/v6e: 128 MiB).
    cap = _vmem_capacity_bytes()
    budget = int(cap * 0.72)

    # ---- Row tile: biggest that fits (sublane multiple), capped so the row
    # grid has >=2 steps when possible (megacore sharding on v7x).
    if tm is None:
        tm = 1024 if budget >= (80 << 20) else 512
    if m <= sub:
        tm = m  # single partial block == full array extent (always legal)
    else:
        tm = min(_round_up(tm, sub), _round_up(m, sub))
        tm = min(tm, _round_up(_cdiv(m, 2), sub))
        tm = max(tm, sub)

    # ---- Hidden tile: keep the whole hidden resident if it fits; otherwise
    # tile it over a second ("arbitrary") grid axis and accumulate.
    def wgt_bytes(te_, nbuf):
        return nbuf * (h_subl * te_ + 8 * te_ + te_ * y_lanes + 8 * y_lanes) * wbytes

    ne = 1
    te = _round_up(emb, 128)
    while te > 128 and wgt_bytes(te, 1 if ne == 1 else 2) > (budget * 3) // 5:
        ne *= 2
        te = _round_up(_cdiv(emb, ne), 128)
    ep = ne * te
    n_wbuf = 1 if ne == 1 else 2

    def act_bytes(tm_):
        return (2 * tm_ * h_lanes * abytes      # double-buffered input tiles
                + 2 * tm_ * y_lanes * abytes    # double-buffered output tiles
                + tm_ * te * 4                  # f32 hidden intermediate
                + 2 * tm_ * y_lanes * 4)        # f32 accumulator / epilogue

    while tm > sub and wgt_bytes(te, n_wbuf) + act_bytes(tm) > budget:
        tm = _round_up(max(tm // 2, sub), sub)

    m_steps = _cdiv(m, tm)
    total_est = wgt_bytes(te, n_wbuf) + act_bytes(tm)
    vmem_limit = int(min(cap * 9 // 10, max(2 * total_est, 32 << 20)))

    # ---- Zero-pad only the weights/biases along the hidden dim (exact).
    h2d = h.reshape(m, h_size)          # free reshape (contiguous leading dims)
    w1p = _pad_to(w1, 1, ep)
    b1p = _pad_to(b1, 1, ep)
    w2p = _pad_to(w2, 0, ep)

    cost = pl.CostEstimate(
        flops=2 * m * ep * (h_size + y_size),
        transcendentals=0,
        bytes_accessed=(m * h_size + m * y_size) * abytes
        + (h_size * ep + ep + ep * y_size + y_size) * wbytes,
    )

    if ne == 1:
        out2d = pl.pallas_call(
            _mlp_kernel_resident,
            out_shape=jax.ShapeDtypeStruct((m, y_size), act_dtype),
            grid_spec=pltpu.PrefetchScalarGridSpec(
                num_scalar_prefetch=0,
                grid=(m_steps,),
                in_specs=[
                    pl.BlockSpec((tm, h_size), lambda i: (i, 0)),        # act tile
                    pl.BlockSpec(memory_space=pltpu.MemorySpace.VMEM),   # W1 resident
                    pl.BlockSpec(memory_space=pltpu.MemorySpace.VMEM),   # b1 resident
                    pl.BlockSpec(memory_space=pltpu.MemorySpace.VMEM),   # W2 resident
                    pl.BlockSpec(memory_space=pltpu.MemorySpace.VMEM),   # b2 resident
                ],
                out_specs=pl.BlockSpec((tm, y_size), lambda i: (i, 0)),
            ),
            compiler_params=pltpu.CompilerParams(
                dimension_semantics=("parallel",),
                vmem_limit_bytes=vmem_limit,
            ),
            cost_estimate=cost,
        )(h2d, w1p, b1p, w2p, b2)
    else:
        out2d = pl.pallas_call(
            _mlp_kernel_hidden_tiled,
            out_shape=jax.ShapeDtypeStruct((m, y_size), act_dtype),
            grid_spec=pltpu.PrefetchScalarGridSpec(
                num_scalar_prefetch=0,
                grid=(m_steps, ne),
                in_specs=[
                    pl.BlockSpec((tm, h_size), lambda i, e: (i, 0)),   # act tile
                    pl.BlockSpec((h_size, te), lambda i, e: (0, e)),   # W1 chunk
                    pl.BlockSpec((1, te), lambda i, e: (0, e)),        # b1 chunk
                    pl.BlockSpec((te, y_size), lambda i, e: (e, 0)),   # W2 chunk
                    pl.BlockSpec((1, y_size), lambda i, e: (0, 0)),    # b2
                ],
                out_specs=pl.BlockSpec((tm, y_size), lambda i, e: (i, 0)),
                scratch_shapes=[pltpu.VMEM((tm, y_size), jnp.float32)],
            ),
            compiler_params=pltpu.CompilerParams(
                dimension_semantics=("parallel", "arbitrary"),
                vmem_limit_bytes=vmem_limit,
            ),
            cost_estimate=cost,
        )(h2d, w1p, b1p, w2p, b2)

    return out2d.reshape(*orig_shape[:-1], y_size)


# ---------------------------------------------------------------------------
# Demo / self-check
# ---------------------------------------------------------------------------
if __name__ == "__main__":
    batch, seq = 2, 8
    h_size, embedding_size, y_size = 32, 64, 16

    key = jax.random.PRNGKey(0)
    k_h, k_w1, k_w2, k_b1, k_b2 = jax.random.split(key, 5)

    h = jax.random.normal(k_h, (batch, seq, h_size), jnp.float32)

    gain = math.sqrt(2.0)  # nn.init.calculate_gain('relu')

    def xavier(k, fan_in, fan_out):
        lim = gain * math.sqrt(6.0 / (fan_in + fan_out))
        return jax.random.uniform(k, (fan_in, fan_out), jnp.float32, -lim, lim)

    # Weights stored [in, out] (= PyTorch weight.T).  Biases keep nn.Linear's
    # default U(-1/sqrt(fan_in), 1/sqrt(fan_in)) init (MLP_plain only re-inits
    # the weights with xavier_uniform_).
    w1 = xavier(k_w1, h_size, embedding_size)
    w2 = xavier(k_w2, embedding_size, y_size)
    b1 = jax.random.uniform(k_b1, (1, embedding_size), jnp.float32,
                            -1.0 / math.sqrt(h_size), 1.0 / math.sqrt(h_size))
    b2 = jax.random.uniform(k_b2, (1, y_size), jnp.float32,
                            -1.0 / math.sqrt(embedding_size),
                            1.0 / math.sqrt(embedding_size))

    y = mlp_plain_forward(h, w1, b1, w2, b2)
    y = jax.block_until_ready(y)

    # Pure-JAX reference.
    ref = jnp.maximum(h @ w1 + b1, 0.0) @ w2 + b2
    assert y.shape == (batch, seq, y_size)
    max_err = float(jnp.max(jnp.abs(y - ref)))
    assert jnp.allclose(y, ref, atol=2e-2, rtol=2e-2), f"max abs err {max_err}"

    print("KERNEL_OK")
</pallas_src>

<mosaic_0001>
module attributes {stable_mosaic.version = 11 : i64} {
  func.func @_mlp_kernel_resident(%arg0: i32, %arg1: memref<8x32xf32, #tpu.memory_space<vmem>>, %arg2: memref<32x128xf32, #tpu.memory_space<vmem>>, %arg3: memref<1x128xf32, #tpu.memory_space<vmem>>, %arg4: memref<128x16xf32, #tpu.memory_space<vmem>>, %arg5: memref<1x16xf32, #tpu.memory_space<vmem>>, %arg6: memref<8x16xf32, #tpu.memory_space<vmem>>) attributes {dimension_semantics = [#tpu.dimension_semantics<parallel>], iteration_bounds = array<i64: 2>, scalar_prefetch = 0 : i64, scratch_operands = 0 : i64, tpu.core_type = #tpu.core_type<tc>, window_params = [{transform_indices = @transform_0, window_bounds = array<i64: 8, 32>}, {pipeline_mode = #tpu.pipeline_mode<synchronous>, transform_indices = @transform_1, window_bounds = array<i64: 32, 128>}, {pipeline_mode = #tpu.pipeline_mode<synchronous>, transform_indices = @transform_2, window_bounds = array<i64: 1, 128>}, {pipeline_mode = #tpu.pipeline_mode<synchronous>, transform_indices = @transform_3, window_bounds = array<i64: 128, 16>}, {pipeline_mode = #tpu.pipeline_mode<synchronous>, transform_indices = @transform_4, window_bounds = array<i64: 1, 16>}, {transform_indices = @transform_5, window_bounds = array<i64: 8, 16>}]} {
    %c0 = arith.constant 0 : index
    %c0_0 = arith.constant 0 : index
    %0 = vector.load %arg1[%c0, %c0_0] : memref<8x32xf32, #tpu.memory_space<vmem>>, vector<8x32xf32>
    %c0_1 = arith.constant 0 : index
    %c0_2 = arith.constant 0 : index
    %1 = vector.load %arg2[%c0_1, %c0_2] : memref<32x128xf32, #tpu.memory_space<vmem>>, vector<32x128xf32>
    %cst = arith.constant dense<0.000000e+00> : vector<8x128xf32>
    %2 = tpu.matmul %0, %1, %cst {dimension_numbers = #tpu.dot_dimension_numbers<[1], [0], [0], [1], [0, 0, 1, 1], [], []>} : vector<8x32xf32>, vector<32x128xf32>, vector<8x128xf32> -> vector<8x128xf32>
    %c0_3 = arith.constant 0 : index
    %c0_4 = arith.constant 0 : index
    %3 = vector.load %arg3[%c0_3, %c0_4] : memref<1x128xf32, #tpu.memory_space<vmem>>, vector<1x128xf32>
    %4 = vector.broadcast %3 : vector<1x128xf32> to vector<8x128xf32>
    %5 = arith.addf %2, %4 : vector<8x128xf32>
    %cst_5 = arith.constant 0.000000e+00 : f32
    %6 = vector.broadcast %cst_5 : f32 to vector<8x128xf32>
    %7 = arith.maximumf %5, %6 : vector<8x128xf32>
    %c0_6 = arith.constant 0 : index
    %c0_7 = arith.constant 0 : index
    %8 = vector.load %arg4[%c0_6, %c0_7] : memref<128x16xf32, #tpu.memory_space<vmem>>, vector<128x16xf32>
    %cst_8 = arith.constant dense<0.000000e+00> : vector<8x16xf32>
    %9 = tpu.matmul %7, %8, %cst_8 {dimension_numbers = #tpu.dot_dimension_numbers<[1], [0], [0], [1], [0, 0, 1, 1], [], []>} : vector<8x128xf32>, vector<128x16xf32>, vector<8x16xf32> -> vector<8x16xf32>
    %c0_9 = arith.constant 0 : index
    %c0_10 = arith.constant 0 : index
    %10 = vector.load %arg5[%c0_9, %c0_10] : memref<1x16xf32, #tpu.memory_space<vmem>>, vector<1x16xf32>
    %11 = vector.broadcast %10 : vector<1x16xf32> to vector<8x16xf32>
    %12 = arith.addf %9, %11 : vector<8x16xf32>
    %c0_11 = arith.constant 0 : index
    %c0_12 = arith.constant 0 : index
    %13 = vector.load %arg6[%c0_11, %c0_12] : memref<8x16xf32, #tpu.memory_space<vmem>>, vector<8x16xf32>
    tpu.vector_store %arg6[%c0_11, %c0_12], %12 {strides = array<i32>} : memref<8x16xf32, #tpu.memory_space<vmem>>, vector<8x16xf32>,
    return
  }
  func.func @transform_0(%arg0: i32) -> (i32, i32) {
    %c0_i32 = arith.constant 0 : i32
    %c0_i32_0 = arith.constant 0 : i32
    return %arg0, %c0_i32 : i32, i32
  }
  func.func @transform_1(%arg0: i32) -> (i32, i32) {
    %c0_i32 = arith.constant 0 : i32
    %c0_i32_0 = arith.constant 0 : i32
    %c0_i32_1 = arith.constant 0 : i32
    return %c0_i32, %c0_i32_0 : i32, i32
  }
  func.func @transform_2(%arg0: i32) -> (i32, i32) {
    %c0_i32 = arith.constant 0 : i32
    %c0_i32_0 = arith.constant 0 : i32
    %c0_i32_1 = arith.constant 0 : i32
    return %c0_i32, %c0_i32_0 : i32, i32
  }
  func.func @transform_3(%arg0: i32) -> (i32, i32) {
    %c0_i32 = arith.constant 0 : i32
    %c0_i32_0 = arith.constant 0 : i32
    %c0_i32_1 = arith.constant 0 : i32
    return %c0_i32, %c0_i32_0 : i32, i32
  }
  func.func @transform_4(%arg0: i32) -> (i32, i32) {
    %c0_i32 = arith.constant 0 : i32
    %c0_i32_0 = arith.constant 0 : i32
    %c0_i32_1 = arith.constant 0 : i32
    return %c0_i32, %c0_i32_0 : i32, i32
  }
  func.func @transform_5(%arg0: i32) -> (i32, i32) {
    %c0_i32 = arith.constant 0 : i32
    %c0_i32_0 = arith.constant 0 : i32
    return %arg0, %c0_i32 : i32, i32
  }
}

</mosaic_0001>

<bundles_post_ra>
// kernel: tpu_custom_call.1
= control target key start
LH: loop header
LB: loop body
LE: loop exit
PB: predicated region body
PF: predicated region fallthrough
CT: control target
= control target key end

     0   :  { %10 = vsyncpa [#allocation3], 0  ;;  %s875_s0 = inlined_call_operand.vmem [shape: f32[16,32], index: 0, kind: input, shape index: {}]   ;;  %s876_s1 = inlined_call_operand.vmem [shape: f32[32,128], index: 1, kind: input, shape index: {}]   ;;  %s877_s2 = inlined_call_operand.vmem [shape: f32[1,128], index: 2, kind: input, shape index: {}]   ;;  %s878_s3 = inlined_call_operand.vmem [shape: f32[128,16], index: 3, kind: input, shape index: {}]   ;;  %s879_s4 = inlined_call_operand.vmem [shape: f32[1,16], index: 4, kind: input, shape index: {}]   ;;  %s880_s5 = inlined_call_operand.hbm [shape: f32[16,16], index: 5, kind: output, shape index: {}]  }
   0x1   :  { %12 = vsyncpa [#allocation3 + $0x1], 0  ;;  %s692_s18 = smov 0   ;;  %s694_s19 = smov 0  }
   0x2   :  { %s696_s20 = smov 0   ;;  %s698_s21 = smov 0  }
   0x3 LB: > { %s713_s22 = sadd.s32 4294967295, %s657_s21   ;;  %s475_s23 = sadd.s32 4294967294, %s657_s21   ;;  %s657_s21 = sphi %s698_s21, %s886_s21   ;;  %s653_s20 = sphi %s696_s20, %s885_s20   ;;  %s649_s19 = sphi %s694_s19, %s884_s19   ;;  %s645_s18 = sphi %s692_s18, %s883_s18  }
   0x4   : > { %s717_s24 = sadd.s32 1, %s657_s21   ;;  %s135_s25 = sadd.s32 1, %s653_s20 }
   0x5   : > { %s132_s26 = ssub.s32 %s657_s21, %s717_s24  ;;  %p145_p0 = scmp.ne.s32.totalorder %s653_s20, %s649_s19 }
   0x6   : > { %p133_p1 = scmp.eq.s32.totalorder %s132_s26, 0  ;;  %p146_p2 = scmp.eq.s32.totalorder %s713_s22, 1 }
   0x7   : > { %p151_p3 = scmp.ne.s32.totalorder %s649_s19, %s645_s18  ;;  %p152_p4 = scmp.eq.s32.totalorder %s475_s23, 1 }
   0x8   : > { %s728_s27 = scalar_select %p133_p1, %s653_s20, %s135_s25  }
   0x9   : > { %p730_p5 = por %p146_p2, %p145_p0  ;;  %p734_p6 = por %p152_p4, %p151_p3 }
   0xa   : > { %p478_p7 = scmp.ge.s32.totalorder %s657_s21, 1  ;;  %p189_p8 = scmp.lt.s32.totalorder %s657_s21, 3 }
   0xc   : > { %p190_p9 = pnand %p478_p7, %p189_p8 }
   0xd   : > { %p216_p10 = scmp.lt.s32.totalorder (!%p190_p9), %s713_s22, 1  ;;  %s213_s26 = sand.u32 (!%p190_p9), 1, %s649_s19  }
   0xe   : > { %193 = sbr.rel (%p190_p9) target bundleno = 433 (0x1b1), region = 40  ;;  %s479_s30 = sshll.u32 (!%p190_p9), %s213_s26, 3 }
   0xf   : > { %s485_s8 = sshll.u32 (!%p190_p9), %s713_s22, 7  ;;  %s215_s9 = scalar_lea.vmem (!%p190_p9), [#allocation2], %s479_s30 }
  0x10   : > { %s416_s10 = sshll.u32 (!%p190_p9), %s215_s9, 4  ;;  %s840_s13 = scalar_lea.hbm (!%p190_p9), %s880_s5, %s485_s8  ;;  %s417_s10 = int_to_ptr.vmem [resolvable:$true] %s416_s10 }
  0x11   : > { %s403_s14 = scalar_lea.sflag (!%p190_p9), [#allocation3], %s213_s26  ;;  %s597_s15 = scalar_lea.vmem (!%p190_p9), %s417_s10, 128 }
  0x12   : > { %p598_p11 = scmp.ne.s32.totalorder (!%p190_p9), %s417_s10, %s597_s15 }
  0x13   : > { %v224_v0 = vld [vmem:[%s876_s1 + $0x18] sm:$0xff]  ;;  %v659_v1 = vmov 0.0   ;;  %v223_v2 = vld [vmem:[%s876_s1 + $0x10] sm:$0xff]  ;;  %vm660_vm0 = vmmov 0   ;;  %s217_s11 = scalar_select %p216_p10, %s713_s22, 1  ;;  %v222_v5 = vld [vmem:[%s876_s1 + $0x8] sm:$0xff] }
  0x14   : > { %510 = vmatprep.subr.mxu0 %v659_v1  ;;  %518 = vmatprep.mubr.msk.f32.mxu0 %vm660_vm0, %v659_v1  ;;  %v322_v3 = vld [vmem:[%s878_s3 + $0x78] sm:$0xff]  ;;  %v321_v4 = vld [vmem:[%s878_s3 + $0x70] sm:$0xff]  ;;  %v320_v6 = vld [vmem:[%s878_s3 + $0x68] sm:$0xff]  ;;  %vm232_vm1 = vcmask 261120   ;;  %vm400_vm2 = vcmask 130048   ;;  %p599_p12 = pnand %p598_p11, %p730_p5  ;;  %s661_s22 = smov [#allocation2]  }
  0x15   : > { %511 = vmatpush3.msra.mxu0 %v224_v0  ;;  %521 = vmatprep.subr.mxu1 %v659_v1  ;;  %s480_s16 = sshll.u32 %s217_s11, 3  ;;  %v221_v7 = vld [vmem:[%s876_s1] sm:$0xff]  ;;  %v318_v10 = vld [vmem:[%s878_s3 + $0x58] sm:$0xff]  ;;  %v317_v11 = vld [vmem:[%s878_s3 + $0x50] sm:$0xff] }
  0x16   : > { %512 = vmatprep.subr.mxu0 %v659_v1  ;;  %522 = vmatpush3.msra.mxu1 %v322_v3  ;;  %s219_s7 = scalar_lea.vmem %s875_s0, %s480_s16  ;;  %v319_v9 = vld [vmem:[%s878_s3 + $0x60] sm:$0xff]  ;;  %v316_v12 = vld [vmem:[%s878_s3 + $0x48] sm:$0xff]  ;;  %v314_v14 = vld [vmem:[%s878_s3 + $0x38] sm:$0xff]  ;;  %p600_p13 = pneg %p599_p12 }
  0x17   : > { %513 = vmatpush3.msra.mxu0 %v223_v2  ;;  %523 = vmatprep.subr.mxu1 %v659_v1  ;;  %v220_v8 = vld [vmem:[%s219_s7] sm:$0xff]  ;;  %v313_v15 = vld [vmem:[%s878_s3 + $0x30] sm:$0xff]  ;;  %v312_v16 = vld [vmem:[%s878_s3 + $0x28] sm:$0xff]  ;;  %s601_s16 = sshll.u32 %s661_s22, 4  ;;  %s602_s16 = int_to_ptr.vmem [resolvable:$false] %s601_s16 }
  0x18   : > { %514 = vmatprep.subr.mxu0 %v659_v1  ;;  %524 = vmatpush3.msra.mxu1 %v321_v4  ;;  %v315_v13 = vld [vmem:[%s878_s3 + $0x40] sm:$0xff]  ;;  %v310_v18 = vld [vmem:[%s878_s3 + $0x18] sm:$0xff]  ;;  %v309_v19 = vld [vmem:[%s878_s3 + $0x10] sm:$0xff]  ;;  %s603_s17 = scalar_lea.vmem %s602_s16, 256  ;;  %p604_p0 = scmp.lt.s32.totalorder %s417_s10, %s602_s16 }
  0x19   : > { %515 = vmatpush3.msra.mxu0 %v222_v5  ;;  %525 = vmatprep.subr.mxu1 %v659_v1  ;;  %v311_v17 = vld [vmem:[%s878_s3 + $0x20] sm:$0xff]  ;;  %v308_v20 = vld [vmem:[%s878_s3 + $0x8] sm:$0xff]  ;;  %p605_p1 = scmp.lt.s32.totalorder %s603_s17, %s597_s15 }
  0x1a   : > { %516 = vmatprep.subr.mxu0 %v659_v1  ;;  %526 = vmatpush3.msra.mxu1 %v320_v6  ;;  %v307_v21 = vld [vmem:[%s878_s3] sm:$0xff] }
  0x1b   : > { %517 = vmatpush3.msra.mxu0 %v221_v7  ;;  %527 = vmatprep.subr.mxu1 %v659_v1  ;;  %v481_v22 = vld [vmem:[%s877_s2] ss:$0 sm:$0xff]  ;;  %p606_p2 = por %p605_p1, %p604_p0 }
  0x1c   : > { %519 = vmatmul.mubr.msk.f32.vlgmr.msra.gmra.mxu0 %vm232_vm1, %v220_v8  ;;  %528 = vmatpush3.msra.mxu1 %v319_v9  ;;  %v483_v27 = vld [vmem:[%s879_s4] ss:$0 sm:$0xff] }
  0x1d   : > { %529 = vmatprep.subr.mxu1 %v659_v1  ;;  %553 = vmatprep.mubr.msk.f32.mxu1 %vm660_vm0, %v659_v1  ;;  %p607_p3 = pnand %p606_p2, %p600_p13 }
  0x1e   : > { %530 = vmatpush3.msra.mxu1 %v318_v10 }
  0x1f   : > { %531 = vmatprep.subr.mxu1 %v659_v1 }
  0x20   : > { %532 = vmatpush3.msra.mxu1 %v317_v11 }
  0x21   : > { %533 = vmatprep.subr.mxu1 %v659_v1 }
  0x22   : > { %534 = vmatpush3.msra.mxu1 %v316_v12 }
  0x23   : > { %535 = vmatprep.subr.mxu1 %v659_v1 }
  0x24   : > { %536 = vmatpush3.msra.mxu1 %v315_v13 }
  0x25   : > { %537 = vmatprep.subr.mxu1 %v659_v1 }
  0x26   : > { %538 = vmatpush3.msra.mxu1 %v314_v14 }
  0x27   : > { %539 = vmatprep.subr.mxu1 %v659_v1 }
  0x28   : > { %540 = vmatpush3.msra.mxu1 %v313_v15 }
  0x29   : > { %541 = vmatprep.subr.mxu1 %v659_v1 }
  0x2a   : > { %542 = vmatpush3.msra.mxu1 %v312_v16 }
  0x2b   : > { %543 = vmatprep.subr.mxu1 %v659_v1 }
  0x2c   : > { %544 = vmatpush3.msra.mxu1 %v311_v17 }
  0x2d   : > { %545 = vmatprep.subr.mxu1 %v659_v1 }
  0x2e   : > { %546 = vmatpush3.msra.mxu1 %v310_v18 }
  0x2f   : > { %547 = vmatprep.subr.mxu1 %v659_v1 }
  0x30   : > { %548 = vmatpush3.msra.mxu1 %v309_v19 }
  0x31   : > { %549 = vmatprep.subr.mxu1 %v659_v1 }
  0x32   : > { %550 = vmatpush3.msra.mxu1 %v308_v20 }
  0x33   : > { %551 = vmatprep.subr.mxu1 %v659_v1 }
  0x34   : > { %552 = vmatpush3.msra.mxu1 %v307_v21 }
  0xdc   : > { %v302_v23 = vpop.f32.mrf.mxu0 }
  0xdd   : > { %v303_v24 = vadd.f32 %v481_v22, %v302_v23 }
  0xde   : > { %v520_v25 = vpop.f32.mrf.mxu0 }
  0xdf   : > { %v306_v26 = vmax.f32 %v303_v24, 0.0 }
  0xe1   : > { %554 = vmatmul.mubr.f32.vlgmr.msra.gmra.mxu1 %v306_v26 }
 0x1a1   : > { %v396_v28 = vpop.f32.mrf.mxu1 }
 0x1a2   : > { %v397_v29 = vadd.f32 %v483_v27, %v396_v28 }
 0x1a3   : > { %v555_v30 = vpop.f32.mrf.mxu1 }
 0x1a4   : > { %401 = vst.msk [vmem:[%s215_s9] sm:$0xff] %vm400_vm2, %v397_v29 }
 0x1a5   : > { %610 = shalt.err (!%p607_p3)
}
 0x1a6   : > { %s611_s23 = scalar_lea.hbm %s840_s13, 128  ;;  %s615_s30 = scalar_lea.hbm %s880_s5, 256 }
 0x1a7   : > { %p612_p4 = scmp.ne.s32.totalorder %s840_s13, %s611_s23  ;;  %p616_p9 = scmp.lt.s32.totalorder %s840_s13, %s880_s5 }
 0x1a8   : > { %p617_p10 = scmp.lt.s32.totalorder %s615_s30, %s611_s23 }
 0x1a9   : > { %p613_p7 = pnand %p612_p4, %p730_p5 }
 0x1aa   : > { %p618_p11 = por %p617_p10, %p616_p9 }
 0x1ab   : > { %p614_p8 = pneg %p613_p7 }
 0x1ad   : > { %p619_p12 = pnand %p618_p11, %p614_p8 }
 0x1af   : > { %622 = shalt.err (!%p619_p12)
}
 0x1b0   : > { %556 = dma.vmem_to_hbm [thread:$0]  (%p730_p5), %s417_s10, 128, %s840_s13, %s403_s14  }
 0x1b1 PF: > { %p562_p13 = scmp.ge.s32.totalorder %s657_s21, 2  ;;  %s428_s8 = sand.u32 1, %s645_s18  }
 0x1b2   : > { %s429_s9 = scalar_lea.sflag [#allocation3], %s428_s8 }
 0x1b3   : > { %p559_p0 = pnand %p562_p13, %p734_p6 }
 0x1b5   : > { %p560_p1 = pneg %p559_p0 }
 0x1b7   : > { %640 = dma.done.wait (%p560_p1), %s429_s9, 128  }
 0x1b8   : > { %642 = vsyncadd (%p560_p1), %s429_s9, 4294967168  ;;  %p15_p2 = scmp.ge.s32.totalorder %s717_s24, 4   ;;  %s883_s18 = smov %s649_s19 }
 0x1b9   : > { %s884_s19 = smov %s653_s20  ;;  %s885_s20 = smov %s728_s27 }
 0x1ba   : > { %s886_s21 = smov %s717_s24  ;;  %17 = sbr.rel (!%p15_p2) target bundleno = 3 (0x3), region = 75 }
 0x1bf   :  { %434 = vsyncpa [#allocation3], 1 }
 0x1c0   :  { %436 = vsyncpa [#allocation3 + $0x1], 1 }

</bundles_post_ra>
